<compile_context>
chip_gen: v6e
topology: v6e:2x2x1
jax: 0.10.0
libtpu: 0.0.40
codegen_flags: <defaults>
</compile_context>

<pallas_src>
import functools
import math

import jax
import jax.numpy as jnp
from jax.experimental import pallas as pl
from jax.experimental.pallas import tpu as pltpu

LN_EPS = 1e-5  # torch.nn.LayerNorm default


# ---------------------------------------------------------------------------
# Kernel: LayerNorm (no affine) + AdaLN modulation on one row tile.
# ---------------------------------------------------------------------------
def ada_layer_norm_kernel(mod_ref, x_ref, o_ref):
    """mod_ref: (2, D) f32, row 0 = 1 + scale, row 1 = shift (VMEM-resident).
    x_ref / o_ref: (tile_m, D) row tile of the flattened activations."""
    x = x_ref[...].astype(jnp.float32)

    # Single-pass mean / variance over the lane (hidden) axis.
    mean = jnp.mean(x, axis=-1, keepdims=True)
    mean_sq = jnp.mean(x * x, axis=-1, keepdims=True)
    var = mean_sq - mean * mean
    xn = (x - mean) * jax.lax.rsqrt(var + LN_EPS)

    scale1 = mod_ref[0:1, :]   # (1, D) broadcast across rows (sublane bcast, VPU)
    shift = mod_ref[1:2, :]
    o_ref[...] = (xn * scale1 + shift).astype(o_ref.dtype)


# ---------------------------------------------------------------------------
# Trace-time configuration (generation-aware tile size / VMEM limit).
# ---------------------------------------------------------------------------
def _pick_config(n_rows: int, d: int, itemsize: int):
    """Pick (tile_m, vmem_limit_bytes) from the device's VMEM capacity."""
    try:
        vmem_cap = int(pltpu.get_tpu_info().vmem_capacity_bytes)
    except Exception:
        vmem_cap = 64 * 1024 * 1024  # conservative (v7x per-TC) fallback

    # Leave headroom below physical capacity; cap at ~100 MiB on big-VMEM chips.
    vmem_limit = min((vmem_cap * 3) // 4, 100 * 1024 * 1024)

    # Budget: double-buffered in + out tiles plus f32 temporaries -> allow one
    # tile copy to use ~1/8 of the scoped limit.
    bytes_per_row = d * max(itemsize, 4)
    target = max(8, min((vmem_limit // 8) // bytes_per_row, 2048))
    target = (target // 8) * 8

    # Keep the grid length >= 2 so the row axis can shard across 2 TCs (v7x).
    half_rows = max(8, (((n_rows + 1) // 2) + 7) // 8 * 8)
    target = min(target, half_rows)

    # Prefer an exact divisor of n_rows so the wrapper never pads (no extra HBM copy).
    tile_m = target
    if n_rows % 8 == 0:
        for cand in range(target, 7, -8):
            if n_rows % cand == 0:
                tile_m = cand
                break
    return tile_m, int(vmem_limit)


# ---------------------------------------------------------------------------
# Wrapper
# ---------------------------------------------------------------------------
@functools.partial(jax.jit, static_argnames=("tile_m", "vmem_limit_bytes"))
def _ada_layer_norm_impl(x, t, emb_table, lin_w, lin_b, *, tile_m, vmem_limit_bytes):
    D = x.shape[-1]
    orig_shape = x.shape

    # --- Hoisted timestep path (tiny; computed once per call) --------------
    e = emb_table[t].astype(jnp.float32)                    # (D,)
    e = e * jax.nn.sigmoid(e)                               # SiLU
    proj = e @ lin_w.astype(jnp.float32).T + lin_b.astype(jnp.float32)  # (2D,)
    scale1 = 1.0 + proj[:D]                                 # scale = first chunk
    shift = proj[D:]
    mod = jnp.stack([scale1, shift], axis=0)                # (2, D) f32

    # --- Flatten rows; pad only if tile_m does not divide the row count ----
    x2 = x.reshape(-1, D)
    N = x2.shape[0]
    n_pad = (-N) % tile_m
    if n_pad:
        x2 = jnp.pad(x2, ((0, n_pad), (0, 0)))
    Np = N + n_pad

    out = pl.pallas_call(
        ada_layer_norm_kernel,
        out_shape=jax.ShapeDtypeStruct((Np, D), x.dtype),
        grid_spec=pltpu.PrefetchScalarGridSpec(
            num_scalar_prefetch=0,
            grid=(Np // tile_m,),
            in_specs=[
                pl.BlockSpec((2, D), lambda i: (0, 0)),        # [1+scale; shift] resident
                pl.BlockSpec((tile_m, D), lambda i: (i, 0)),   # x row tile
            ],
            out_specs=pl.BlockSpec((tile_m, D), lambda i: (i, 0)),
        ),
        compiler_params=pltpu.CompilerParams(
            dimension_semantics=("parallel",),
            vmem_limit_bytes=vmem_limit_bytes,
        ),
    )(mod, x2)

    return out[:N].reshape(orig_shape)


def ada_layer_norm(x, t, emb_table, lin_w, lin_b):
    """x: (..., D) float; t: scalar int32 timestep index.

    emb_table: (num_embeddings, D)
    lin_w:     (2*D, D)   (torch nn.Linear weight layout)
    lin_b:     (2*D,)
    """
    D = x.shape[-1]
    n_rows = math.prod(x.shape[:-1]) if x.ndim > 1 else 1
    tile_m, vmem_limit = _pick_config(n_rows, D, jnp.dtype(x.dtype).itemsize)
    return _ada_layer_norm_impl(
        x, t, emb_table, lin_w, lin_b, tile_m=tile_m, vmem_limit_bytes=vmem_limit
    )


# ---------------------------------------------------------------------------
# Pure-JAX reference mirroring the PyTorch forward.
# ---------------------------------------------------------------------------
def ada_layer_norm_reference(x, t, emb_table, lin_w, lin_b):
    e = emb_table[t]
    e = e * jax.nn.sigmoid(e)
    emb = e @ lin_w.T + lin_b                       # (2*D,)
    D = x.shape[-1]
    scale, shift = emb[:D], emb[D:]
    mean = jnp.mean(x, axis=-1, keepdims=True)
    var = jnp.mean(jnp.square(x - mean), axis=-1, keepdims=True)
    xn = (x - mean) * jax.lax.rsqrt(var + LN_EPS)
    return xn * (1.0 + scale) + shift


if __name__ == "__main__":
    B, S, D = 2, 8, 32            # batch, seq, embedding_dim
    num_embeddings = 16           # timestep vocabulary size

    key = jax.random.PRNGKey(0)
    k_x, k_emb, k_w, k_b = jax.random.split(key, 4)

    x = jax.random.normal(k_x, (B, S, D), dtype=jnp.float32)
    t = jnp.array(3, dtype=jnp.int32)

    # Deterministic synthetic parameters (shapes from the module __init__).
    emb_table = jax.random.normal(k_emb, (num_embeddings, D), dtype=jnp.float32)
    lin_w = jax.random.normal(k_w, (2 * D, D), dtype=jnp.float32) * (1.0 / jnp.sqrt(D))
    lin_b = jax.random.normal(k_b, (2 * D,), dtype=jnp.float32) * 0.02

    out = ada_layer_norm(x, t, emb_table, lin_w, lin_b)
    out = jax.block_until_ready(out)

    ref = ada_layer_norm_reference(x, t, emb_table, lin_w, lin_b)
    assert out.shape == x.shape and out.dtype == x.dtype
    assert jnp.allclose(out, ref, atol=1e-5, rtol=1e-5), "mismatch vs reference"

    print("KERNEL_OK")
</pallas_src>

<mosaic_0001>
module attributes {stable_mosaic.version = 11 : i64} {
  func.func @ada_layer_norm_kernel(%arg0: i32, %arg1: memref<2x32xf32, #tpu.memory_space<vmem>>, %arg2: memref<8x32xf32, #tpu.memory_space<vmem>>, %arg3: memref<8x32xf32, #tpu.memory_space<vmem>>) attributes {dimension_semantics = [#tpu.dimension_semantics<parallel>], iteration_bounds = array<i64: 2>, scalar_prefetch = 0 : i64, scratch_operands = 0 : i64, tpu.core_type = #tpu.core_type<tc>, window_params = [{pipeline_mode = #tpu.pipeline_mode<synchronous>, transform_indices = @transform_0, window_bounds = array<i64: 2, 32>}, {transform_indices = @transform_1, window_bounds = array<i64: 8, 32>}, {transform_indices = @transform_2, window_bounds = array<i64: 8, 32>}]} {
    %c0 = arith.constant 0 : index
    %c0_0 = arith.constant 0 : index
    %0 = vector.load %arg2[%c0, %c0_0] : memref<8x32xf32, #tpu.memory_space<vmem>>, vector<8x32xf32>
    %cst = arith.constant dense<0.000000e+00> : vector<8xf32>
    %1 = vector.multi_reduction <add>, %0, %cst [1] : vector<8x32xf32> to vector<8xf32>
    %2 = vector.shape_cast %1 : vector<8xf32> to vector<8x1xf32>
    %cst_1 = arith.constant 3.200000e+01 : f32
    %3 = vector.broadcast %cst_1 : f32 to vector<8x1xf32>
    %4 = arith.divf %2, %3 : vector<8x1xf32>
    %5 = arith.mulf %0, %0 : vector<8x32xf32>
    %cst_2 = arith.constant dense<0.000000e+00> : vector<8xf32>
    %6 = vector.multi_reduction <add>, %5, %cst_2 [1] : vector<8x32xf32> to vector<8xf32>
    %7 = vector.shape_cast %6 : vector<8xf32> to vector<8x1xf32>
    %cst_3 = arith.constant 3.200000e+01 : f32
    %8 = vector.broadcast %cst_3 : f32 to vector<8x1xf32>
    %9 = arith.divf %7, %8 : vector<8x1xf32>
    %10 = arith.mulf %4, %4 : vector<8x1xf32>
    %11 = arith.subf %9, %10 : vector<8x1xf32>
    %12 = vector.broadcast %4 : vector<8x1xf32> to vector<8x32xf32>
    %13 = arith.subf %0, %12 : vector<8x32xf32>
    %cst_4 = arith.constant 9.99999974E-6 : f32
    %14 = vector.broadcast %cst_4 : f32 to vector<8x1xf32>
    %15 = arith.addf %11, %14 : vector<8x1xf32>
    %16 = math.rsqrt %15 : vector<8x1xf32>
    %17 = vector.broadcast %16 : vector<8x1xf32> to vector<8x32xf32>
    %18 = arith.mulf %13, %17 : vector<8x32xf32>
    %c0_5 = arith.constant 0 : index
    %c0_6 = arith.constant 0 : index
    %19 = vector.load %arg1[%c0_5, %c0_6] : memref<2x32xf32, #tpu.memory_space<vmem>>, vector<1x32xf32>
    %c1 = arith.constant 1 : index
    %c0_7 = arith.constant 0 : index
    %20 = vector.load %arg1[%c1, %c0_7] : memref<2x32xf32, #tpu.memory_space<vmem>>, vector<1x32xf32>
    %21 = vector.broadcast %19 : vector<1x32xf32> to vector<8x32xf32>
    %22 = arith.mulf %18, %21 : vector<8x32xf32>
    %23 = vector.broadcast %20 : vector<1x32xf32> to vector<8x32xf32>
    %24 = arith.addf %22, %23 : vector<8x32xf32>
    %c0_8 = arith.constant 0 : index
    %c0_9 = arith.constant 0 : index
    %25 = vector.load %arg3[%c0_8, %c0_9] : memref<8x32xf32, #tpu.memory_space<vmem>>, vector<8x32xf32>
    tpu.vector_store %arg3[%c0_8, %c0_9], %24 {strides = array<i32>} : memref<8x32xf32, #tpu.memory_space<vmem>>, vector<8x32xf32>,
    return
  }
  func.func @transform_0(%arg0: i32) -> (i32, i32) {
    %c0_i32 = arith.constant 0 : i32
    %c0_i32_0 = arith.constant 0 : i32
    %c0_i32_1 = arith.constant 0 : i32
    return %c0_i32, %c0_i32_0 : i32, i32
  }
  func.func @transform_1(%arg0: i32) -> (i32, i32) {
    %c0_i32 = arith.constant 0 : i32
    %c0_i32_0 = arith.constant 0 : i32
    return %arg0, %c0_i32 : i32, i32
  }
  func.func @transform_2(%arg0: i32) -> (i32, i32) {
    %c0_i32 = arith.constant 0 : i32
    %c0_i32_0 = arith.constant 0 : i32
    return %arg0, %c0_i32 : i32, i32
  }
}

</mosaic_0001>

<bundles_post_ra>
// kernel: _ada_layer_norm_impl.1
= control target key start
LH: loop header
LB: loop body
LE: loop exit
PB: predicated region body
PF: predicated region fallthrough
CT: control target
= control target key end

     0   :  { %7 = vsyncpa [#allocation3], 0  ;;  %s470_s0 = inlined_call_operand.vmem [shape: f32[2,32], index: 0, kind: input, shape index: {}]   ;;  %s471_s1 = inlined_call_operand.vmem [shape: f32[16,32], index: 1, kind: input, shape index: {}]   ;;  %s472_s2 = inlined_call_operand.hbm [shape: f32[16,32], index: 2, kind: output, shape index: {}]  }
   0x1   :  { %9 = vsyncpa [#allocation3 + $0x1], 0  ;;  %s374_s9 = smov 0   ;;  %s376_s10 = smov 0  }
   0x2   :  { %s378_s11 = smov 0   ;;  %s380_s12 = smov 0  }
   0x3 LB: > { %s395_s13 = sadd.s32 4294967295, %s356_s12   ;;  %s243_s14 = sadd.s32 4294967294, %s356_s12   ;;  %s356_s12 = sphi %s380_s12, %s478_s12   ;;  %s352_s11 = sphi %s378_s11, %s477_s11   ;;  %s348_s10 = sphi %s376_s10, %s476_s10   ;;  %s344_s9 = sphi %s374_s9, %s475_s9  }
   0x4   : > { %s399_s15 = sadd.s32 1, %s356_s12   ;;  %s69_s16 = sadd.s32 1, %s352_s11 }
   0x5   : > { %s66_s17 = ssub.s32 %s356_s12, %s399_s15  ;;  %p79_p0 = scmp.ne.s32.totalorder %s352_s11, %s348_s10 }
   0x6   : > { %p67_p1 = scmp.eq.s32.totalorder %s66_s17, 0  ;;  %p80_p2 = scmp.eq.s32.totalorder %s395_s13, 1 }
   0x7   : > { %p85_p3 = scmp.ne.s32.totalorder %s348_s10, %s344_s9  ;;  %p86_p4 = scmp.eq.s32.totalorder %s243_s14, 1 }
   0x8   : > { %s410_s18 = scalar_select %p67_p1, %s352_s11, %s69_s16  }
   0x9   : > { %p412_p5 = por %p80_p2, %p79_p0  ;;  %p416_p6 = por %p86_p4, %p85_p3 }
   0xa   : > { %p246_p7 = scmp.ge.s32.totalorder %s356_s12, 1  ;;  %p114_p8 = scmp.lt.s32.totalorder %s356_s12, 3 }
   0xc   : > { %p115_p9 = pnand %p246_p7, %p114_p8 }
   0xd   : > { %p135_p10 = scmp.lt.s32.totalorder (!%p115_p9), %s395_s13, 1  ;;  %s132_s26 = sand.u32 (!%p115_p9), 1, %s348_s10  }
   0xe   : > { %118 = sbr.rel (%p115_p9) target bundleno = 206 (0xce), region = 28  ;;  %s247_s27 = sshll.u32 (!%p115_p9), %s132_s26, 3 }
   0xf   : > { %s252_s4 = sshll.u32 (!%p115_p9), %s395_s13, 7  ;;  %s134_s5 = scalar_lea.vmem (!%p115_p9), [#allocation2], %s247_s27 }
  0x10   : > { %s184_s6 = sshll.u32 (!%p115_p9), %s134_s5, 4  ;;  %s182_s14 = scalar_lea.hbm (!%p115_p9), %s472_s2, %s252_s4  ;;  %s185_s6 = int_to_ptr.vmem [resolvable:$true] %s184_s6 }
  0x11   : > { %s171_s16 = scalar_lea.sflag (!%p115_p9), [#allocation3], %s132_s26  ;;  %s296_s17 = scalar_lea.vmem (!%p115_p9), %s185_s6, 128 }
  0x12   : > { %p297_p11 = scmp.ne.s32.totalorder (!%p115_p9), %s185_s6, %s296_s17 }
  0x13   : > { %s136_s21 = scalar_select %p135_p10, %s395_s13, 1  ;;  %vm140_vm0 = vcmask 261120   ;;  %v249_v13 = vld [vmem:[%s470_s0] ss:$0 sm:$0xff]  ;;  %v250_v15 = vld [vmem:[%s470_s0 + $0x1] ss:$0 sm:$0xff] }
  0x14   : > { %p298_p12 = pnand %p297_p11, %p412_p5 }
  0x15   : > { %s248_s22 = sshll.u32 %s136_s21, 3  ;;  %s358_s21 = smov [#allocation2]  }
  0x16   : > { %s138_s25 = scalar_lea.vmem %s471_s1, %s248_s22  ;;  %p299_p13 = pneg %p298_p12 }
  0x17   : > { %v139_v0 = vld [vmem:[%s138_s25] sm:$0xff]  ;;  %s300_s22 = sshll.u32 %s358_s21, 4  ;;  %s301_s22 = int_to_ptr.vmem [resolvable:$false] %s300_s22 }
  0x18   : > { %v141_v1 = vsel %vm140_vm0, %v139_v0, 0.0  ;;  %v146_v2 = vmul.f32 %v139_v0, %v139_v0  ;;  %s302_s13 = scalar_lea.vmem %s301_s22, 256  ;;  %p303_p0 = scmp.lt.s32.totalorder %s185_s6, %s301_s22 }
  0x19   : > { %142 = vadd.xlane.f32.xlu0 %v141_v1  ;;  %p304_p1 = scmp.lt.s32.totalorder %s302_s13, %s296_s17 }
  0x1a   : > { %v147_v3 = vsel %vm140_vm0, %v146_v2, 0.0 }
  0x1b   : > { %p305_p2 = por %p304_p1, %p303_p0 }
  0x1d   : > { %148 = vadd.xlane.f32.xlu0 %v147_v3  ;;  %p306_p3 = pnand %p305_p2, %p299_p13 }
  0xa2   : > { %v143_v4 = vpop.xlane.xlu0 %142 }
  0xa3   : > { %v145_v5 = vmul.f32 0.03125, %v143_v4 }
  0xa5   : > { %v151_v7 = vmul.f32 %v145_v5, %v145_v5  ;;  %v153_v11 = vsub.f32 %v139_v0, %v145_v5 }
  0xa6   : > { %v149_v6 = vpop.xlane.xlu0 %148 }
  0xa7   : > { %v150_v8 = vmul.f32 0.03125, %v149_v6 }
  0xa9   : > { %v152_v9 = vsub.f32 %v150_v8, %v151_v7 }
  0xab   : > { %v154_v10 = vadd.f32 1e-05, %v152_v9 }
  0xad   : > { %294 = vrsqrt.f32 %v154_v10 }
  0xba   : > { %v295_v12 = vpop.eup %294 }
  0xbb   : > { %v156_v14 = vmul.f32 %v295_v12, %v153_v11 }
  0xbd   : > { %v163_v16 = vmul.f32 %v249_v13, %v156_v14 }
  0xbf   : > { %v168_v17 = vadd.f32 %v250_v15, %v163_v16 }
  0xc1   : > { %169 = vst.msk [vmem:[%s134_s5] sm:$0xff] %vm140_vm0, %v168_v17 }
  0xc2   : > { %309 = shalt.err (!%p306_p3)
}
  0xc3   : > { %s310_s23 = scalar_lea.hbm %s182_s14, 128  ;;  %s314_s26 = scalar_lea.hbm %s472_s2, 256 }
  0xc4   : > { %p311_p4 = scmp.ne.s32.totalorder %s182_s14, %s310_s23  ;;  %p315_p9 = scmp.lt.s32.totalorder %s182_s14, %s472_s2 }
  0xc5   : > { %p316_p10 = scmp.lt.s32.totalorder %s314_s26, %s310_s23 }
  0xc6   : > { %p312_p7 = pnand %p311_p4, %p412_p5 }
  0xc7   : > { %p317_p11 = por %p316_p10, %p315_p9 }
  0xc8   : > { %p313_p8 = pneg %p312_p7 }
  0xca   : > { %p318_p12 = pnand %p317_p11, %p313_p8 }
  0xcc   : > { %321 = shalt.err (!%p318_p12)
}
  0xcd   : > { %255 = dma.vmem_to_hbm [thread:$0]  (%p412_p5), %s185_s6, 128, %s182_s14, %s171_s16  }
  0xce PF: > { %p261_p13 = scmp.ge.s32.totalorder %s356_s12, 2  ;;  %s196_s29 = sand.u32 1, %s344_s9  }
  0xcf   : > { %s197_s30 = scalar_lea.sflag [#allocation3], %s196_s29 }
  0xd0   : > { %p258_p0 = pnand %p261_p13, %p416_p6 }
  0xd2   : > { %p259_p1 = pneg %p258_p0 }
  0xd4   : > { %339 = dma.done.wait (%p259_p1), %s197_s30, 128  }
  0xd5   : > { %341 = vsyncadd (%p259_p1), %s197_s30, 4294967168  ;;  %p12_p2 = scmp.ge.s32.totalorder %s399_s15, 4   ;;  %s475_s9 = smov %s348_s10 }
  0xd6   : > { %s476_s10 = smov %s352_s11  ;;  %s477_s11 = smov %s410_s18 }
  0xd7   : > { %s478_s12 = smov %s399_s15  ;;  %14 = sbr.rel (!%p12_p2) target bundleno = 3 (0x3), region = 63 }
  0xdc   :  { %202 = vsyncpa [#allocation3], 1 }
  0xdd   :  { %204 = vsyncpa [#allocation3 + $0x1], 1 }

</bundles_post_ra>
